<compile_context>
chip_gen: v7x
topology: tpu7x:2x2x1
jax: 0.10.0
libtpu: 0.0.40
codegen_flags: <defaults>
</compile_context>

<pallas_src>
import jax
import jax.numpy as jnp
from jax.experimental import pallas as pl
from jax.experimental.pallas import tpu as pltpu

_LANE = 128      # vreg lane width
_SUBLANE = 8     # vreg sublane count (f32)


def _round_up(n: int, m: int) -> int:
    return ((n + m - 1) // m) * m


def _pad_to(a, shape):
    pads = [(0, t - s) for s, t in zip(a.shape, shape)]
    if all(p == (0, 0) for p in pads):
        return a
    return jnp.pad(a, pads)


def mlp_kernel(x_ref, w1_ref, b1_ref, w2_ref, b2_ref, o_ref):
    # x:  (TB, Fp)   w1: (Fp, Hp)   b1: (1, Hp)
    # w2: (Hp, Op)   b2: (1, Op)    out: (TB, Op)
    x = x_ref[...]
    h = jnp.dot(x, w1_ref[...], preferred_element_type=jnp.float32) + b1_ref[...]
    h = jnp.maximum(h, 0.0)  # ReLU on VPU, f32
    o = jnp.dot(h, w2_ref[...], preferred_element_type=jnp.float32) + b2_ref[...]
    o_ref[...] = o.astype(o_ref.dtype)


def mlp_forward(x, w1, b1, w2, b2, *, block_b: int = 512):
    """Fused Linear -> ReLU -> Linear.

    x: (B, F) f32; w1: (F, H); b1: (H,); w2: (H, O); b2: (O,)
    Returns (B, O) f32.
    """
    B, F = x.shape
    H = w1.shape[1]
    O = w2.shape[1]

    # Lane-dense padded sizes (multiples of 128 on the last dim of every matmul
    # operand / result). Zero padding is mathematically a no-op here.
    Fp = _round_up(F, _LANE)
    Hp = _round_up(H, _LANE)
    Op = _round_up(O, _LANE)

    # Batch tile: whole (8-aligned) batch if small, else block_b rows per step.
    TB = min(block_b, _round_up(B, _SUBLANE))
    B_pad = _round_up(B, TB)
    grid = (B_pad // TB,)

    x_p = _pad_to(x, (B_pad, Fp))
    w1_p = _pad_to(w1, (Fp, Hp))
    b1_p = _pad_to(b1.reshape(1, -1), (1, Hp))
    w2_p = _pad_to(w2, (Hp, Op))
    b2_p = _pad_to(b2.reshape(1, -1), (1, Op))

    out_p = pl.pallas_call(
        mlp_kernel,
        out_shape=jax.ShapeDtypeStruct((B_pad, Op), x.dtype),
        grid=grid,
        in_specs=[
            pl.BlockSpec((TB, Fp), lambda i: (i, 0)),   # x: tiled over batch
            pl.BlockSpec((Fp, Hp), lambda i: (0, 0)),   # w1: resident
            pl.BlockSpec((1, Hp), lambda i: (0, 0)),    # b1: resident
            pl.BlockSpec((Hp, Op), lambda i: (0, 0)),   # w2: resident
            pl.BlockSpec((1, Op), lambda i: (0, 0)),    # b2: resident
        ],
        out_specs=pl.BlockSpec((TB, Op), lambda i: (i, 0)),
        compiler_params=pltpu.CompilerParams(
            dimension_semantics=("parallel",),          # megacore on v7x
            vmem_limit_bytes=64 * 1024 * 1024,
        ),
    )(x_p, w1_p, b1_p, w2_p, b2_p)

    return out_p[:B, :O]


def init_params(key, n_feature, n_hidden, n_output):
    # Deterministic init mimicking PyTorch nn.Linear default:
    # U(-1/sqrt(fan_in), 1/sqrt(fan_in)) for both weight and bias.
    k1, k2, k3, k4 = jax.random.split(key, 4)
    bound1 = 1.0 / jnp.sqrt(n_feature)
    bound2 = 1.0 / jnp.sqrt(n_hidden)
    # Weights stored as (in, out) so the kernel does x @ W directly
    # (PyTorch stores (out, in) and does x @ W.T — mathematically identical).
    w1 = jax.random.uniform(k1, (n_feature, n_hidden), jnp.float32, -bound1, bound1)
    b1 = jax.random.uniform(k2, (n_hidden,), jnp.float32, -bound1, bound1)
    w2 = jax.random.uniform(k3, (n_hidden, n_output), jnp.float32, -bound2, bound2)
    b2 = jax.random.uniform(k4, (n_output,), jnp.float32, -bound2, bound2)
    return w1, b1, w2, b2


def _reference(x, w1, b1, w2, b2):
    return jnp.maximum(x @ w1 + b1, 0.0) @ w2 + b2


if __name__ == "__main__":
    n_feature, n_hidden, n_output = 16, 32, 4

    key = jax.random.PRNGKey(0)
    kx, kp, kx2 = jax.random.split(key, 3)
    w1, b1, w2, b2 = init_params(kp, n_feature, n_hidden, n_output)

    # Small-shape check (single grid point, whole batch in one tile).
    batch = 8
    x = jax.random.normal(kx, (batch, n_feature), jnp.float32)
    out = jax.block_until_ready(mlp_forward(x, w1, b1, w2, b2))
    ref = _reference(x, w1, b1, w2, b2)
    assert out.shape == (batch, n_output)
    assert jnp.allclose(out, ref, atol=1e-5, rtol=1e-5)

    # Larger-batch check to exercise the tiled / pipelined path (grid > 1).
    batch_big = 1024
    x_big = jax.random.normal(kx2, (batch_big, n_feature), jnp.float32)
    out_big = jax.block_until_ready(mlp_forward(x_big, w1, b1, w2, b2))
    ref_big = _reference(x_big, w1, b1, w2, b2)
    assert out_big.shape == (batch_big, n_output)
    assert jnp.allclose(out_big, ref_big, atol=1e-5, rtol=1e-5)

    print("KERNEL_OK")
</pallas_src>

<mosaic_0001>
module attributes {stable_mosaic.version = 11 : i64} {
  func.func @mlp_kernel(%arg0: i32, %arg1: memref<8x128xf32, #tpu.memory_space<vmem>>, %arg2: memref<128x128xf32, #tpu.memory_space<vmem>>, %arg3: memref<1x128xf32, #tpu.memory_space<vmem>>, %arg4: memref<128x128xf32, #tpu.memory_space<vmem>>, %arg5: memref<1x128xf32, #tpu.memory_space<vmem>>, %arg6: memref<8x128xf32, #tpu.memory_space<vmem>>) attributes {dimension_semantics = [#tpu.dimension_semantics<parallel>], iteration_bounds = array<i64: 1>, scalar_prefetch = 0 : i64, scratch_operands = 0 : i64, tpu.core_type = #tpu.core_type<tc>, window_params = [{transform_indices = @transform_0, window_bounds = array<i64: 8, 128>}, {pipeline_mode = #tpu.pipeline_mode<synchronous>, transform_indices = @transform_1, window_bounds = array<i64: 128, 128>}, {pipeline_mode = #tpu.pipeline_mode<synchronous>, transform_indices = @transform_2, window_bounds = array<i64: 1, 128>}, {pipeline_mode = #tpu.pipeline_mode<synchronous>, transform_indices = @transform_3, window_bounds = array<i64: 128, 128>}, {pipeline_mode = #tpu.pipeline_mode<synchronous>, transform_indices = @transform_4, window_bounds = array<i64: 1, 128>}, {transform_indices = @transform_5, window_bounds = array<i64: 8, 128>}]} {
    %c0 = arith.constant 0 : index
    %c0_0 = arith.constant 0 : index
    %0 = vector.load %arg1[%c0, %c0_0] : memref<8x128xf32, #tpu.memory_space<vmem>>, vector<8x128xf32>
    %c0_1 = arith.constant 0 : index
    %c0_2 = arith.constant 0 : index
    %1 = vector.load %arg2[%c0_1, %c0_2] : memref<128x128xf32, #tpu.memory_space<vmem>>, vector<128x128xf32>
    %cst = arith.constant dense<0.000000e+00> : vector<8x128xf32>
    %2 = tpu.matmul %0, %1, %cst {dimension_numbers = #tpu.dot_dimension_numbers<[1], [0], [0], [1], [0, 0, 1, 1], [], []>} : vector<8x128xf32>, vector<128x128xf32>, vector<8x128xf32> -> vector<8x128xf32>
    %c0_3 = arith.constant 0 : index
    %c0_4 = arith.constant 0 : index
    %3 = vector.load %arg3[%c0_3, %c0_4] : memref<1x128xf32, #tpu.memory_space<vmem>>, vector<1x128xf32>
    %4 = vector.broadcast %3 : vector<1x128xf32> to vector<8x128xf32>
    %5 = arith.addf %2, %4 : vector<8x128xf32>
    %cst_5 = arith.constant 0.000000e+00 : f32
    %6 = vector.broadcast %cst_5 : f32 to vector<8x128xf32>
    %7 = arith.maximumf %5, %6 : vector<8x128xf32>
    %c0_6 = arith.constant 0 : index
    %c0_7 = arith.constant 0 : index
    %8 = vector.load %arg4[%c0_6, %c0_7] : memref<128x128xf32, #tpu.memory_space<vmem>>, vector<128x128xf32>
    %cst_8 = arith.constant dense<0.000000e+00> : vector<8x128xf32>
    %9 = tpu.matmul %7, %8, %cst_8 {dimension_numbers = #tpu.dot_dimension_numbers<[1], [0], [0], [1], [0, 0, 1, 1], [], []>} : vector<8x128xf32>, vector<128x128xf32>, vector<8x128xf32> -> vector<8x128xf32>
    %c0_9 = arith.constant 0 : index
    %c0_10 = arith.constant 0 : index
    %10 = vector.load %arg5[%c0_9, %c0_10] : memref<1x128xf32, #tpu.memory_space<vmem>>, vector<1x128xf32>
    %11 = vector.broadcast %10 : vector<1x128xf32> to vector<8x128xf32>
    %12 = arith.addf %9, %11 : vector<8x128xf32>
    %c0_11 = arith.constant 0 : index
    %c0_12 = arith.constant 0 : index
    %13 = vector.load %arg6[%c0_11, %c0_12] : memref<8x128xf32, #tpu.memory_space<vmem>>, vector<8x128xf32>
    tpu.vector_store %arg6[%c0_11, %c0_12], %12 {strides = array<i32>} : memref<8x128xf32, #tpu.memory_space<vmem>>, vector<8x128xf32>,
    return
  }
  func.func @transform_0(%arg0: i32) -> (i32, i32) {
    %c0_i32 = arith.constant 0 : i32
    %c0_i32_0 = arith.constant 0 : i32
    return %arg0, %c0_i32 : i32, i32
  }
  func.func @transform_1(%arg0: i32) -> (i32, i32) {
    %c0_i32 = arith.constant 0 : i32
    %c0_i32_0 = arith.constant 0 : i32
    %c0_i32_1 = arith.constant 0 : i32
    return %c0_i32, %c0_i32_0 : i32, i32
  }
  func.func @transform_2(%arg0: i32) -> (i32, i32) {
    %c0_i32 = arith.constant 0 : i32
    %c0_i32_0 = arith.constant 0 : i32
    %c0_i32_1 = arith.constant 0 : i32
    return %c0_i32, %c0_i32_0 : i32, i32
  }
  func.func @transform_3(%arg0: i32) -> (i32, i32) {
    %c0_i32 = arith.constant 0 : i32
    %c0_i32_0 = arith.constant 0 : i32
    %c0_i32_1 = arith.constant 0 : i32
    return %c0_i32, %c0_i32_0 : i32, i32
  }
  func.func @transform_4(%arg0: i32) -> (i32, i32) {
    %c0_i32 = arith.constant 0 : i32
    %c0_i32_0 = arith.constant 0 : i32
    %c0_i32_1 = arith.constant 0 : i32
    return %c0_i32, %c0_i32_0 : i32, i32
  }
  func.func @transform_5(%arg0: i32) -> (i32, i32) {
    %c0_i32 = arith.constant 0 : i32
    %c0_i32_0 = arith.constant 0 : i32
    return %arg0, %c0_i32 : i32, i32
  }
}

</mosaic_0001>

<bundles_post_ra>
// kernel: tpu_custom_call.1
= control target key start
LH: loop header
LB: loop body
LE: loop exit
PB: predicated region body
PF: predicated region fallthrough
CT: control target
= control target key end

     0   :  { %10 = vsyncpa [#allocation3], 0  ;;  %s723_s0 = inlined_call_operand.hbm [shape: f32[8,128], index: 0, kind: input, shape index: {}]   ;;  %s724_s1 = inlined_call_operand.hbm [shape: f32[128,128], index: 1, kind: input, shape index: {}]   ;;  %s725_s2 = inlined_call_operand.hbm [shape: f32[1,128], index: 2, kind: input, shape index: {}]   ;;  %s726_s3 = inlined_call_operand.hbm [shape: f32[128,128], index: 3, kind: input, shape index: {}]   ;;  %s727_s4 = inlined_call_operand.hbm [shape: f32[1,128], index: 4, kind: input, shape index: {}]   ;;  %s728_s5 = inlined_call_operand.hbm [shape: f32[8,128], index: 5, kind: output, shape index: {}]  }
   0x1   :  { %11 = vsyncpa [#allocation6], 0 }
   0x2   :  { %12 = vsyncpa [#allocation9], 0 }
   0x3   :  { %13 = vsyncpa [#allocation4], 0  ;;  %s594_s18 = smov [#allocation5]   ;;  %s454_s22 = scalar_lea.hbm %s724_s1, 2048 }
   0x4   :  { %s29_s19 = sshll.u32 %s594_s18, 4  ;;  %p455_p0 = scmp.ne.s32.totalorder %s724_s1, %s454_s22  ;;  %s30_s19 = int_to_ptr.vmem [resolvable:$true] %s29_s19 }
   0x5   :  { %p458_p1 = scmp.lt.u32.totalorder %s454_s22, %s724_s1 }
   0x7   :  { %p460_p2 = pnand %p458_p1, %p455_p0 }
   0x9   :  { %463 = shalt.err (!%p460_p2)
}
   0xa   :  { %s464_s27 = scalar_lea.vmem %s30_s19, 2048  ;;  %p469_p4 = scmp.lt.s32.totalorder %s30_s19, %s30_s19 }
   0xb   :  { %p465_p3 = scmp.ne.s32.totalorder %s30_s19, %s464_s27  ;;  %p470_p5 = scmp.lt.s32.totalorder %s464_s27, %s464_s27 }
   0xd   :  { %p471_p6 = por %p470_p5, %p469_p4 }
   0xf   :  { %p472_p7 = pnand %p471_p6, %p465_p3 }
  0x11   :  { %475 = shalt.err (!%p472_p7)
}
  0x12   :  { %s595_s28 = smov 128   ;;  %s596_s29 = smov 8  }
  0x13   :  { %35 = dma.hbm_to_vmem [thread:$0]  %s724_s1, 2048, %s30_s19, [#allocation6], %s595_s28, %s595_s28, %s596_s29  }
  0x14   :  { %s597_s7 = smov [#allocation8]   ;;  %s598_s9 = smov [#allocation2]  }
  0x15   :  { %s51_s8 = sshll.u32 %s597_s7, 4  ;;  %s20_s10 = sshll.u32 %s598_s9, 4  ;;  %s52_s8 = int_to_ptr.vmem [resolvable:$true] %s51_s8  ;;  %s21_s10 = int_to_ptr.vmem [resolvable:$true] %s20_s10 }
  0x16   :  { %s476_s13 = scalar_lea.hbm %s726_s3, 2048 }
  0x17   :  { %p477_p8 = scmp.ne.s32.totalorder %s726_s3, %s476_s13  ;;  %p480_p9 = scmp.lt.u32.totalorder %s476_s13, %s726_s3 }
  0x19   :  { %p482_p10 = pnand %p480_p9, %p477_p8 }
  0x1b   :  { %485 = shalt.err (!%p482_p10)
}
  0x1c   :  { %s486_s1 = scalar_lea.vmem %s52_s8, 2048  ;;  %p491_p12 = scmp.lt.s32.totalorder %s52_s8, %s52_s8 }
  0x1d   :  { %p487_p11 = scmp.ne.s32.totalorder %s52_s8, %s486_s1  ;;  %p492_p13 = scmp.lt.s32.totalorder %s486_s1, %s486_s1 }
  0x1f   :  { %p493_p0 = por %p492_p13, %p491_p12 }
  0x21   :  { %p494_p1 = pnand %p493_p0, %p487_p11 }
  0x23   :  { %497 = shalt.err (!%p494_p1)
}
  0x24   :  { %57 = dma.hbm_to_vmem [thread:$0]  %s726_s3, 2048, %s52_s8, [#allocation9], %s595_s28, %s595_s28, %s596_s29  }
  0x25   :  { %s498_s22 = scalar_lea.hbm %s723_s0, 128 }
  0x26   :  { %p499_p2 = scmp.ne.s32.totalorder %s723_s0, %s498_s22  ;;  %p502_p3 = scmp.lt.u32.totalorder %s498_s22, %s723_s0 }
  0x28   :  { %p504_p4 = pnand %p502_p3, %p499_p2 }
  0x2a   :  { %507 = shalt.err (!%p504_p4)
}
  0x2b   :  { %s508_s27 = scalar_lea.vmem %s21_s10, 128  ;;  %p513_p6 = scmp.lt.s32.totalorder %s21_s10, %s21_s10 }
  0x2c   :  { %p509_p5 = scmp.ne.s32.totalorder %s21_s10, %s508_s27  ;;  %p514_p7 = scmp.lt.s32.totalorder %s508_s27, %s508_s27 }
  0x2e   :  { %p515_p8 = por %p514_p7, %p513_p6 }
  0x30   :  { %p516_p9 = pnand %p515_p8, %p509_p5 }
  0x32   :  { %519 = shalt.err (!%p516_p9)
}
  0x33   :  { %23 = dma.hbm_to_vmem [thread:$0]  %s723_s0, 128, %s21_s10, [#allocation3]  }
  0x34   :  { %s599_s29 = smov [#allocation7]   ;;  %s600_s6 = smov [#allocation10]  }
  0x35   :  { %s42_s30 = sshll.u32 %s599_s29, 4  ;;  %s64_s7 = sshll.u32 %s600_s6, 4  ;;  %s43_s30 = int_to_ptr.vmem [resolvable:$true] %s42_s30  ;;  %s65_s7 = int_to_ptr.vmem [resolvable:$true] %s64_s7 }
  0x36   :  { %s520_s11 = scalar_lea.hbm %s725_s2, 16 }
  0x37   :  { %p521_p10 = scmp.ne.s32.totalorder %s725_s2, %s520_s11  ;;  %p524_p11 = scmp.lt.u32.totalorder %s520_s11, %s725_s2 }
  0x39   :  { %p526_p12 = pnand %p524_p11, %p521_p10 }
  0x3b   :  { %529 = shalt.err (!%p526_p12)
}
  0x3c   :  { %s530_s0 = scalar_lea.vmem %s43_s30, 16  ;;  %s534_s10 = scalar_lea.vmem %s43_s30, 32 }
  0x3d   :  { %p531_p13 = scmp.ne.s32.totalorder %s43_s30, %s530_s0  ;;  %p535_p0 = scmp.lt.s32.totalorder %s43_s30, %s43_s30 }
  0x3e   :  { %p536_p1 = scmp.lt.s32.totalorder %s534_s10, %s530_s0 }
  0x40   :  { %p537_p2 = por %p536_p1, %p535_p0 }
  0x42   :  { %p538_p3 = pnand %p537_p2, %p531_p13 }
  0x44   :  { %541 = shalt.err (!%p538_p3)
}
  0x45   :  { %45 = dma.hbm_to_vmem [thread:$0]  %s725_s2, 16, %s43_s30, [#allocation6]  }
  0x46   :  { %s542_s19 = scalar_lea.hbm %s727_s4, 16 }
  0x47   :  { %p543_p4 = scmp.ne.s32.totalorder %s727_s4, %s542_s19  ;;  %p546_p5 = scmp.lt.u32.totalorder %s542_s19, %s727_s4 }
  0x49   :  { %p548_p6 = pnand %p546_p5, %p543_p4 }
  0x4b   :  { %551 = shalt.err (!%p548_p6)
}
  0x4c   :  { %s552_s24 = scalar_lea.vmem %s65_s7, 16  ;;  %s556_s25 = scalar_lea.vmem %s65_s7, 32 }
  0x4d   :  { %p553_p7 = scmp.ne.s32.totalorder %s65_s7, %s552_s24  ;;  %p557_p8 = scmp.lt.s32.totalorder %s65_s7, %s65_s7 }
  0x4e   :  { %p558_p9 = scmp.lt.s32.totalorder %s556_s25, %s552_s24 }
  0x50   :  { %p559_p10 = por %p558_p9, %p557_p8 }
  0x52   :  { %p560_p11 = pnand %p559_p10, %p553_p7 }
  0x54   :  { %563 = shalt.err (!%p560_p11)
}
  0x55   :  { %67 = dma.hbm_to_vmem [thread:$0]  %s727_s4, 16, %s65_s7, [#allocation9]  }
  0x56   :  { %586 = dma.done.wait [#allocation3], 128  }
  0x57   :  { %587 = vsyncadd [#allocation3], 4294967168 }
  0x58   :  { %588 = dma.done.wait [#allocation6], 2064  }
  0x59   :  { %589 = vsyncadd [#allocation6], 4294965232 }
  0x5a   :  { %590 = dma.done.wait [#allocation9], 2064  }
  0x5b   :  { %591 = vsyncadd [#allocation9], 4294965232  ;;  %v601_v0 = vmov 0.0|0.0   ;;  %vm602_vm0 = vmmov 0   ;;  %v603_v1 = vmov 0.0   ;;  %v84_v2 = vld [vmem:[#allocation5] sm:$0xff] }
  0x5c   :  { %395 = vmatprep.subr.bf16.mxu0 %v601_v0  ;;  %357 = vmatprep.mubr.msk.f32.mxu0 %vm602_vm0, %v603_v1  ;;  %v85_v3 = vld [vmem:[#allocation5 + $0x8] sm:$0xff]  ;;  %v86_v4 = vld [vmem:[#allocation5 + $0x10] sm:$0xff]  ;;  %v87_v6 = vld [vmem:[#allocation5 + $0x18] sm:$0xff]  ;;  %s604_s4 = smov [#allocation11]  }
  0x5d   :  { %419 = vmatprep.subr.bf16.mxu1 %v601_v0  ;;  %392 = vmatprep.mubr.msk.f32.mxu1 %vm602_vm0, %v603_v1  ;;  %v396_v5 = vpack.c.bf16 %v85_v3, %v84_v2  ;;  %v399_v7 = vpack.c.bf16 %v87_v6, %v86_v4  ;;  %v88_v8 = vld [vmem:[#allocation5 + $0x20] sm:$0xff]  ;;  %v89_v9 = vld [vmem:[#allocation5 + $0x28] sm:$0xff]  ;;  %v180_v12 = vld [vmem:[#allocation8 + $0x10] sm:$0xff]  ;;  %s278_s27 = sshll.u32 %s604_s4, 4  ;;  %s279_s27 = int_to_ptr.vmem [resolvable:$true] %s278_s27 }
  0x5e   :  { %v178_v10 = vld [vmem:[#allocation8] sm:$0xff]  ;;  %v179_v11 = vld [vmem:[#allocation8 + $0x8] sm:$0xff]  ;;  %v181_v13 = vld [vmem:[#allocation8 + $0x18] sm:$0xff]  ;;  %v402_v14 = vpack.c.bf16 %v89_v9, %v88_v8  ;;  %s564_s3 = scalar_lea.vmem %s279_s27, 128  ;;  %p569_p13 = scmp.lt.s32.totalorder %s279_s27, %s279_s27 }
  0x5f   :  { %397 = vmatpush3.bf16.msra.mxu0 %v396_v5  ;;  %v420_v15 = vpack.c.bf16 %v179_v11, %v178_v10  ;;  %v90_v16 = vld [vmem:[#allocation5 + $0x30] sm:$0xff]  ;;  %v91_v17 = vld [vmem:[#allocation5 + $0x38] sm:$0xff]  ;;  %v423_v18 = vpack.c.bf16 %v181_v13, %v180_v12  ;;  %v182_v19 = vld [vmem:[#allocation8 + $0x20] sm:$0xff]  ;;  %p565_p12 = scmp.ne.s32.totalorder %s279_s27, %s564_s3  ;;  %p570_p0 = scmp.lt.s32.totalorder %s564_s3, %s564_s3 }
  0x60   :  { %398 = vmatprep.subr.bf16.mxu0 %v601_v0  ;;  %v183_v20 = vld [vmem:[#allocation8 + $0x28] sm:$0xff]  ;;  %v405_v21 = vpack.c.bf16 %v91_v17, %v90_v16  ;;  %v92_v22 = vld [vmem:[#allocation5 + $0x40] sm:$0xff]  ;;  %v184_v25 = vld [vmem:[#allocation8 + $0x30] sm:$0xff] }
  0x61   :  { %421 = vmatpush3.bf16.msra.mxu1 %v420_v15  ;;  %v93_v23 = vld [vmem:[#allocation5 + $0x48] sm:$0xff]  ;;  %v426_v24 = vpack.c.bf16 %v183_v20, %v182_v19  ;;  %v185_v26 = vld [vmem:[#allocation8 + $0x38] sm:$0xff]  ;;  %v94_v28 = vld [vmem:[#allocation5 + $0x50] sm:$0xff]  ;;  %p571_p1 = por %p570_p0, %p569_p13 }
  0x62   :  { %422 = vmatprep.subr.bf16.mxu1 %v601_v0  ;;  %v408_v27 = vpack.c.bf16 %v93_v23, %v92_v22  ;;  %v95_v29 = vld [vmem:[#allocation5 + $0x58] sm:$0xff]  ;;  %v429_v30 = vpack.c.bf16 %v185_v26, %v184_v25  ;;  %v186_v31 = vld [vmem:[#allocation8 + $0x40] sm:$0xff]  ;;  %v187_v32 = vld [vmem:[#allocation8 + $0x48] sm:$0xff] }
  0x63   :  { %400 = vmatpush3.bf16.msra.mxu0 %v399_v7  ;;  %v411_v33 = vpack.c.bf16 %v95_v29, %v94_v28  ;;  %v96_v34 = vld [vmem:[#allocation5 + $0x60] sm:$0xff]  ;;  %v97_v35 = vld [vmem:[#allocation5 + $0x68] sm:$0xff]  ;;  %v432_v36 = vpack.c.bf16 %v187_v32, %v186_v31  ;;  %v188_v37 = vld [vmem:[#allocation8 + $0x50] sm:$0xff]  ;;  %p572_p2 = pnand %p571_p1, %p565_p12 }
  0x64   :  { %401 = vmatprep.subr.bf16.mxu0 %v601_v0  ;;  %v189_v38 = vld [vmem:[#allocation8 + $0x58] sm:$0xff]  ;;  %v414_v39 = vpack.c.bf16 %v97_v35, %v96_v34  ;;  %v98_v40 = vld [vmem:[#allocation5 + $0x70] sm:$0xff]  ;;  %v190_v43 = vld [vmem:[#allocation8 + $0x60] sm:$0xff] }
  0x65   :  { %424 = vmatpush3.bf16.msra.mxu1 %v423_v18  ;;  %v99_v41 = vld [vmem:[#allocation5 + $0x78] sm:$0xff]  ;;  %v435_v42 = vpack.c.bf16 %v189_v38, %v188_v37  ;;  %v191_v44 = vld [vmem:[#allocation8 + $0x68] sm:$0xff]  ;;  %v289_v51 = vld [vmem:[#allocation7] ss:$0 sm:$0xff] }
  0x66   :  { %425 = vmatprep.subr.bf16.mxu1 %v601_v0  ;;  %v417_v45 = vpack.c.bf16 %v99_v41, %v98_v40  ;;  %v438_v46 = vpack.c.bf16 %v191_v44, %v190_v43  ;;  %v83_v47 = vld [vmem:[#allocation2] sm:$0xff]  ;;  %v290_v56 = vld [vmem:[#allocation10] ss:$0 sm:$0xff] }
  0x67   :  { %403 = vmatpush3.bf16.msra.mxu0 %v402_v14  ;;  %v192_v48 = vld [vmem:[#allocation8 + $0x70] sm:$0xff]  ;;  %v193_v49 = vld [vmem:[#allocation8 + $0x78] sm:$0xff] }
  0x68   :  { %404 = vmatprep.subr.bf16.mxu0 %v601_v0  ;;  %v441_v50 = vpack.c.bf16 %v193_v49, %v192_v48 }
  0x69   :  { %427 = vmatpush3.bf16.msra.mxu1 %v426_v24 }
  0x6a   :  { %428 = vmatprep.subr.bf16.mxu1 %v601_v0 }
  0x6b   :  { %406 = vmatpush3.bf16.msra.mxu0 %v405_v21 }
  0x6c   :  { %407 = vmatprep.subr.bf16.mxu0 %v601_v0 }
  0x6d   :  { %430 = vmatpush3.bf16.msra.mxu1 %v429_v30 }
  0x6e   :  { %431 = vmatprep.subr.bf16.mxu1 %v601_v0 }
  0x6f   :  { %409 = vmatpush3.bf16.msra.mxu0 %v408_v27 }
  0x70   :  { %410 = vmatprep.subr.bf16.mxu0 %v601_v0 }
  0x71   :  { %433 = vmatpush3.bf16.msra.mxu1 %v432_v36 }
  0x72   :  { %434 = vmatprep.subr.bf16.mxu1 %v601_v0 }
  0x73   :  { %412 = vmatpush3.bf16.msra.mxu0 %v411_v33 }
  0x74   :  { %413 = vmatprep.subr.bf16.mxu0 %v601_v0 }
  0x75   :  { %436 = vmatpush3.bf16.msra.mxu1 %v435_v42 }
  0x76   :  { %437 = vmatprep.subr.bf16.mxu1 %v601_v0 }
  0x77   :  { %415 = vmatpush3.bf16.msra.mxu0 %v414_v39 }
  0x78   :  { %416 = vmatprep.subr.bf16.mxu0 %v601_v0 }
  0x79   :  { %439 = vmatpush3.bf16.msra.mxu1 %v438_v46 }
  0x7a   :  { %440 = vmatprep.subr.bf16.mxu1 %v601_v0 }
  0x7b   :  { %418 = vmatpush3.bf16.msra.mxu0 %v417_v45 }
  0x7d   :  { %442 = vmatpush3.bf16.msra.mxu1 %v441_v50 }
  0x7e   :  { %358 = vmatmul.mubr.f32.vlgmr.msra.gmra.mrb[0].mxu0 %v83_v47 }
 0x151   :  { %v173_v52 = vpop.f32.mrb[0].mxu0 }
 0x152   :  { %v174_v53 = vadd.f32 %v289_v51, %v173_v52  ;;  %v359_v54 = vpop.f32.mrb[1].mxu0 }
 0x154   :  { %v177_v55 = vmax.f32 %v174_v53, 0.0 }
 0x156   :  { %393 = vmatmul.mubr.f32.vlgmr.msra.gmra.mrb[0].mxu1 %v177_v55 }
 0x229   :  { %v267_v57 = vpop.f32.mrb[0].mxu1 }
 0x22a   :  { %v268_v58 = vadd.f32 %v290_v56, %v267_v57  ;;  %v394_v59 = vpop.f32.mrb[1].mxu1 }
 0x22c   :  { %271 = vst [vmem:[#allocation11] sm:$0xff] %v268_v58 }
 0x22d   :  { %575 = shalt.err (!%p572_p2)
}
 0x22e   :  { %s576_s30 = scalar_lea.hbm %s728_s5, 128 }
 0x22f   :  { %p577_p3 = scmp.ne.s32.totalorder %s728_s5, %s576_s30  ;;  %p580_p4 = scmp.lt.u32.totalorder %s576_s30, %s728_s5 }
 0x231   :  { %p582_p5 = pnand %p580_p4, %p577_p3 }
 0x233   :  { %585 = shalt.err (!%p582_p5)
}
 0x234   :  { %281 = dma.vmem_to_hbm [thread:$0]  %s279_s27, 128, %s728_s5, [#allocation4]  }
 0x235   :  { %592 = dma.done.wait [#allocation4], 128  }
 0x236   :  { %593 = vsyncadd [#allocation4], 4294967168 }
 0x237   :  { %285 = vsyncpa [#allocation3], 1 }
 0x238   :  { %286 = vsyncpa [#allocation6], 1 }
 0x239   :  { %287 = vsyncpa [#allocation9], 1 }
 0x23a   :  { %288 = vsyncpa [#allocation4], 1 }

</bundles_post_ra>
